<compile_context>
chip_gen: v7x
topology: tpu7x:2x2x1
jax: 0.10.0
libtpu: 0.0.40
codegen_flags: <defaults>
</compile_context>

<pallas_src>
import functools

import jax
import jax.numpy as jnp
from jax import lax
from jax.experimental import pallas as pl
from jax.experimental.pallas import tpu as pltpu

IN_FEATURES = 29

# Single packed-parameter array: (out, in) weights with the bias as an extra column,
# hidden size 7 zero-padded to 8 and the 29 output rows to 32.
_PACK_SHAPE = (64, 32)

_TB_CAP = 8192                      # max batch rows per grid step
_VMEM_LIMIT_BYTES = 48 * 1024 * 1024


def _round_up(n, m):
    return ((n + m - 1) // m) * m


def _leaky_relu(x, negative_slope=0.01):
    # nn.LeakyReLU default negative_slope = 0.01
    return jnp.where(x >= 0, x, negative_slope * x)


def _detect_num_tensorcores():
    """Best-effort TensorCore count (v7x has 2 per chip); defaults to 1."""
    try:
        info = pltpu.get_tpu_info()
        for name in ("num_tensorcores", "tensorcore_count", "num_cores", "core_count"):
            v = getattr(info, name, None)
            if isinstance(v, int) and v > 0:
                return v
    except Exception:
        pass
    try:
        if "v7" in jax.devices()[0].device_kind.lower():
            return 2
    except Exception:
        pass
    return 1


_NUM_TENSORCORES = _detect_num_tensorcores()


def autoencoder_kernel(x_ref, p_ref, o_ref):
    # x_ref: (rows, 29) batch-major tile; p_ref: (64, 32) packed params; o_ref: (rows, 29).
    x = x_ref[...]
    p = p_ref[...]

    w1, b1 = p[0:14, 0:29], p[0:14, 29:30]      # (14,29), (14,1)
    w2, b2 = p[16:24, 0:14], p[16:24, 14:15]    # (8,14),  (8,1)   row 7 is zero padding
    w3, b3 = p[24:32, 0:8],  p[24:32, 8:9]      # (8,8),   (8,1)   row/col 7 zero padding
    w4, b4 = p[32:64, 0:8],  p[32:64, 8:9]      # (32,8),  (32,1)  rows 29..31 / col 7 zero

    # Encoder.  Layer 1 contracts the feature axis of the batch-major tile directly
    # (W1 @ x^T via a transposed-RHS dot), so no explicit input transpose is needed;
    # everything downstream is feature-major and lane-dense in the batch dimension.
    h = lax.dot_general(w1, x, (((1,), (1,)), ((), ())),
                        preferred_element_type=jnp.float32)                       # (14, rows)
    h = jnp.tanh(h + b1)
    h = _leaky_relu(jnp.dot(w2, h, preferred_element_type=jnp.float32) + b2)      # (8, rows)

    # Decoder.
    h = jnp.tanh(jnp.dot(w3, h, preferred_element_type=jnp.float32) + b3)         # (8, rows)
    h = _leaky_relu(jnp.dot(w4, h, preferred_element_type=jnp.float32) + b4)      # (32, rows)

    # Back to batch-major for the store; columns 29..31 are the zero padding rows.
    o_ref[...] = jnp.transpose(h)[:, :IN_FEATURES].astype(o_ref.dtype)


def pack_params(params):
    """Pack all 4 layers (PyTorch (out,in) weights + (out,1) biases) into one array."""
    p = jnp.zeros(_PACK_SHAPE, jnp.float32)
    p = p.at[0:14, 0:29].set(params["w1"])
    p = p.at[0:14, 29].set(params["b1"][:, 0])
    p = p.at[16:23, 0:14].set(params["w2"])
    p = p.at[16:23, 14].set(params["b2"][:, 0])
    p = p.at[24:31, 0:7].set(params["w3"])
    p = p.at[24:31, 8].set(params["b3"][:, 0])
    p = p.at[32:61, 0:7].set(params["w4"])
    p = p.at[32:61, 8].set(params["b4"][:, 0])
    return p


def _pick_block_rows(batch):
    """Largest 8-aligned tile up to _TB_CAP; only split for multi-TensorCore chips."""
    rows = min(_TB_CAP, batch - batch % 8)          # batch >= 8 here
    if _NUM_TENSORCORES > 1:
        per_core = _round_up(pl.cdiv(batch, _NUM_TENSORCORES), 8)
        rows = min(rows, max(per_core, 8))
    return max(rows, 8)


@functools.partial(jax.jit, static_argnames=("block_rows",))
def _autoencoder_pallas(x, params, block_rows):
    batch = x.shape[0]
    packed = pack_params(params)
    grid = (pl.cdiv(batch, block_rows),)            # partial last block handled by Pallas
    return pl.pallas_call(
        autoencoder_kernel,
        out_shape=jax.ShapeDtypeStruct((batch, IN_FEATURES), jnp.float32),
        grid_spec=pltpu.PrefetchScalarGridSpec(
            num_scalar_prefetch=0,
            grid=grid,
            in_specs=[
                pl.BlockSpec((block_rows, IN_FEATURES), lambda i: (i, 0)),
                pl.BlockSpec(_PACK_SHAPE, lambda i: (0, 0)),   # resident, fetched once
            ],
            out_specs=pl.BlockSpec((block_rows, IN_FEATURES), lambda i: (i, 0)),
        ),
        compiler_params=pltpu.CompilerParams(
            dimension_semantics=("parallel",),
            vmem_limit_bytes=_VMEM_LIMIT_BYTES,
        ),
    )(x, packed)


def autoencoder_forward(x, params):
    """x: (B, 29) float32 -> (B, 29) float32. params: PyTorch-layout weights/biases."""
    B, F = x.shape
    assert F == IN_FEATURES
    pad = 0
    if B < 8:                       # tiny edge case; normal batches are passed through
        pad = 8 - B
        x = jnp.pad(x, ((0, pad), (0, 0)))
    rows = _pick_block_rows(x.shape[0])
    out = _autoencoder_pallas(x, params, rows)
    return out[:B] if pad else out


def init_params(key):
    """Deterministic init mirroring PyTorch nn.Linear default
    (U[-1/sqrt(fan_in), 1/sqrt(fan_in)]). Weights are (out, in); biases (out, 1)."""
    dims = [(14, 29), (7, 14), (7, 7), (29, 7)]     # (out_features, in_features)
    params = {}
    for idx, (fan_out, fan_in) in enumerate(dims, start=1):
        key, kw, kb = jax.random.split(key, 3)
        bound = 1.0 / jnp.sqrt(jnp.float32(fan_in))
        params[f"w{idx}"] = jax.random.uniform(
            kw, (fan_out, fan_in), jnp.float32, -bound, bound)
        params[f"b{idx}"] = jax.random.uniform(
            kb, (fan_out, 1), jnp.float32, -bound, bound)
    return params


def reference_forward(x, params):
    # Pure-JAX reference in (batch, feature) layout at highest matmul precision.
    hp = jax.lax.Precision.HIGHEST
    h = jnp.tanh(jnp.dot(x, params["w1"].T, precision=hp) + params["b1"][:, 0])
    h = _leaky_relu(jnp.dot(h, params["w2"].T, precision=hp) + params["b2"][:, 0])
    h = jnp.tanh(jnp.dot(h, params["w3"].T, precision=hp) + params["b3"][:, 0])
    return _leaky_relu(jnp.dot(h, params["w4"].T, precision=hp) + params["b4"][:, 0])


if __name__ == "__main__":
    key = jax.random.PRNGKey(0)
    kx, kp = jax.random.split(key)

    B = 256                                    # small demo batch
    x = jax.random.normal(kx, (B, IN_FEATURES), jnp.float32)
    params = init_params(kp)

    out = autoencoder_forward(x, params)
    out = jax.block_until_ready(out)

    ref = reference_forward(x, params)
    assert out.shape == (B, IN_FEATURES)
    # Tolerance covers a possibly reduced-precision default f32 MXU matmul path vs.
    # the HIGHEST-precision reference (precision=HIGHEST is deliberately not used in
    # the kernel to avoid extra MXU passes on the tiny-K matmuls); real logic bugs
    # produce O(0.1+) errors.
    assert jnp.allclose(out, ref, atol=1e-2, rtol=1e-2), "mismatch vs JAX reference"

    print("KERNEL_OK")
</pallas_src>

<mosaic_0001>
module attributes {stable_mosaic.version = 11 : i64} {
  func.func @autoencoder_kernel(%arg0: i32, %arg1: memref<256x29xf32, #tpu.memory_space<vmem>>, %arg2: memref<64x32xf32, #tpu.memory_space<vmem>>, %arg3: memref<256x29xf32, #tpu.memory_space<vmem>>) attributes {dimension_semantics = [#tpu.dimension_semantics<parallel>], iteration_bounds = array<i64: 1>, scalar_prefetch = 0 : i64, scratch_operands = 0 : i64, tpu.core_type = #tpu.core_type<tc>, window_params = [{transform_indices = @transform_0, window_bounds = array<i64: 256, 29>}, {pipeline_mode = #tpu.pipeline_mode<synchronous>, transform_indices = @transform_1, window_bounds = array<i64: 64, 32>}, {transform_indices = @transform_2, window_bounds = array<i64: 256, 29>}]} {
    %c0 = arith.constant 0 : index
    %c0_0 = arith.constant 0 : index
    %0 = vector.load %arg1[%c0, %c0_0] : memref<256x29xf32, #tpu.memory_space<vmem>>, vector<256x29xf32>
    %c0_1 = arith.constant 0 : index
    %c0_2 = arith.constant 0 : index
    %1 = vector.load %arg2[%c0_1, %c0_2] : memref<64x32xf32, #tpu.memory_space<vmem>>, vector<64x32xf32>
    %2 = vector.extract_strided_slice %1 {offsets = [0, 0], sizes = [14, 29], strides = [1, 1]} : vector<64x32xf32> to vector<14x29xf32>
    %3 = vector.extract_strided_slice %1 {offsets = [0, 29], sizes = [14, 1], strides = [1, 1]} : vector<64x32xf32> to vector<14x1xf32>
    %4 = vector.extract_strided_slice %1 {offsets = [16, 0], sizes = [8, 14], strides = [1, 1]} : vector<64x32xf32> to vector<8x14xf32>
    %5 = vector.extract_strided_slice %1 {offsets = [16, 14], sizes = [8, 1], strides = [1, 1]} : vector<64x32xf32> to vector<8x1xf32>
    %6 = vector.extract_strided_slice %1 {offsets = [24, 0], sizes = [8, 8], strides = [1, 1]} : vector<64x32xf32> to vector<8x8xf32>
    %7 = vector.extract_strided_slice %1 {offsets = [24, 8], sizes = [8, 1], strides = [1, 1]} : vector<64x32xf32> to vector<8x1xf32>
    %8 = vector.extract_strided_slice %1 {offsets = [32, 0], sizes = [32, 8], strides = [1, 1]} : vector<64x32xf32> to vector<32x8xf32>
    %9 = vector.extract_strided_slice %1 {offsets = [32, 8], sizes = [32, 1], strides = [1, 1]} : vector<64x32xf32> to vector<32x1xf32>
    %cst = arith.constant dense<0.000000e+00> : vector<14x256xf32>
    %10 = tpu.matmul %2, %0, %cst {dimension_numbers = #tpu.dot_dimension_numbers<[1], [1], [0], [0], [0, 0, 1, 0], [], []>} : vector<14x29xf32>, vector<256x29xf32>, vector<14x256xf32> -> vector<14x256xf32>
    %11 = vector.broadcast %3 : vector<14x1xf32> to vector<14x256xf32>
    %12 = arith.addf %10, %11 : vector<14x256xf32>
    %13 = math.tanh %12 : vector<14x256xf32>
    %cst_3 = arith.constant dense<0.000000e+00> : vector<8x256xf32>
    %14 = tpu.matmul %4, %13, %cst_3 {dimension_numbers = #tpu.dot_dimension_numbers<[1], [0], [0], [1], [0, 0, 1, 1], [], []>} : vector<8x14xf32>, vector<14x256xf32>, vector<8x256xf32> -> vector<8x256xf32>
    %15 = vector.broadcast %5 : vector<8x1xf32> to vector<8x256xf32>
    %16 = arith.addf %14, %15 : vector<8x256xf32>
    %cst_4 = arith.constant 0.000000e+00 : f32
    %17 = vector.broadcast %cst_4 : f32 to vector<8x256xf32>
    %18 = arith.cmpf oge, %16, %17 : vector<8x256xf32>
    %cst_5 = arith.constant 0.00999999977 : f32
    %19 = vector.broadcast %cst_5 : f32 to vector<8x256xf32>
    %20 = arith.mulf %19, %16 : vector<8x256xf32>
    %21 = arith.select %18, %16, %20 : vector<8x256xi1>, vector<8x256xf32>
    %cst_6 = arith.constant dense<0.000000e+00> : vector<8x256xf32>
    %22 = tpu.matmul %6, %21, %cst_6 {dimension_numbers = #tpu.dot_dimension_numbers<[1], [0], [0], [1], [0, 0, 1, 1], [], []>} : vector<8x8xf32>, vector<8x256xf32>, vector<8x256xf32> -> vector<8x256xf32>
    %23 = vector.broadcast %7 : vector<8x1xf32> to vector<8x256xf32>
    %24 = arith.addf %22, %23 : vector<8x256xf32>
    %25 = math.tanh %24 : vector<8x256xf32>
    %cst_7 = arith.constant dense<0.000000e+00> : vector<32x256xf32>
    %26 = tpu.matmul %8, %25, %cst_7 {dimension_numbers = #tpu.dot_dimension_numbers<[1], [0], [0], [1], [0, 0, 1, 1], [], []>} : vector<32x8xf32>, vector<8x256xf32>, vector<32x256xf32> -> vector<32x256xf32>
    %27 = vector.broadcast %9 : vector<32x1xf32> to vector<32x256xf32>
    %28 = arith.addf %26, %27 : vector<32x256xf32>
    %cst_8 = arith.constant 0.000000e+00 : f32
    %29 = vector.broadcast %cst_8 : f32 to vector<32x256xf32>
    %30 = arith.cmpf oge, %28, %29 : vector<32x256xf32>
    %cst_9 = arith.constant 0.00999999977 : f32
    %31 = vector.broadcast %cst_9 : f32 to vector<32x256xf32>
    %32 = arith.mulf %31, %28 : vector<32x256xf32>
    %33 = arith.select %30, %28, %32 : vector<32x256xi1>, vector<32x256xf32>
    %34 = tpu.transpose %33, [1, 0] : vector<32x256xf32> -> vector<256x32xf32>
    %35 = vector.extract_strided_slice %34 {offsets = [0, 0], sizes = [256, 29], strides = [1, 1]} : vector<256x32xf32> to vector<256x29xf32>
    %c0_10 = arith.constant 0 : index
    %c0_11 = arith.constant 0 : index
    %36 = vector.load %arg3[%c0_10, %c0_11] : memref<256x29xf32, #tpu.memory_space<vmem>>, vector<256x29xf32>
    tpu.vector_store %arg3[%c0_10, %c0_11], %35 {strides = array<i32>} : memref<256x29xf32, #tpu.memory_space<vmem>>, vector<256x29xf32>,
    return
  }
  func.func @transform_0(%arg0: i32) -> (i32, i32) {
    %c0_i32 = arith.constant 0 : i32
    %c0_i32_0 = arith.constant 0 : i32
    return %arg0, %c0_i32 : i32, i32
  }
  func.func @transform_1(%arg0: i32) -> (i32, i32) {
    %c0_i32 = arith.constant 0 : i32
    %c0_i32_0 = arith.constant 0 : i32
    %c0_i32_1 = arith.constant 0 : i32
    return %c0_i32, %c0_i32_0 : i32, i32
  }
  func.func @transform_2(%arg0: i32) -> (i32, i32) {
    %c0_i32 = arith.constant 0 : i32
    %c0_i32_0 = arith.constant 0 : i32
    return %arg0, %c0_i32 : i32, i32
  }
}

</mosaic_0001>

<bundles_post_ra>
// kernel: _autoencoder_pallas.1
= control target key start
LH: loop header
LB: loop body
LE: loop exit
PB: predicated region body
PF: predicated region fallthrough
CT: control target
= control target key end

     0   :  { %vm61_vm0 = vcmask 236544   ;;  %v810_v3 = vmov 29   ;;  %v811_v52 = vmov 0.0   ;;  %v812_v54 = vmov 14   ;;  %s1131_s0 = inlined_call_operand.vmem [shape: f32[256,29], index: 0, kind: input, shape index: {}]   ;;  %s1132_s1 = inlined_call_operand.vmem [shape: f32[64,32], index: 1, kind: input, shape index: {}]   ;;  %s1133_s2 = inlined_call_operand.vmem [shape: f32[256,29], index: 2, kind: output, shape index: {}]  }
   0x1   :  { %v27_v0 = vld [vmem:[%s1131_s0 + $0x80] sm:$0xff]  ;;  %v28_v1 = vld [vmem:[%s1131_s0 + $0x88] sm:$0xff]  ;;  %vm838_vm1 = vmpackc.low %vm61_vm0, %vm61_vm0  ;;  %794 = vset.pattern.permute.xlu0 %v810_v3  ;;  %322 = vmatprep.mubr.f32.mxu1 %v811_v52  ;;  %vm251_vm2 = vcmask 1045504   ;;  %vm813_vm3 = vmmov 1   ;;  %vm248_vm5 = vcmask 113664   ;;  %vm340_vm8 = vcmask 64512  }
   0x2   :  { %v735_v4 = vpack.c.bf16 %v28_v1, %v27_v0  ;;  %v11_v5 = vld [vmem:[%s1131_s0] sm:$0xff]  ;;  %v12_v6 = vld [vmem:[%s1131_s0 + $0x8] sm:$0xff]  ;;  %v29_v7 = vld [vmem:[%s1131_s0 + $0x90] sm:$0xff]  ;;  %795 = vset.pattern.permute.xlu1 %v812_v54 }
   0x3   :  { %v738_v8 = vpack.c.bf16 %v12_v6, %v11_v5  ;;  %v30_v9 = vld [vmem:[%s1131_s0 + $0x98] sm:$0xff]  ;;  %v13_v11 = vld [vmem:[%s1131_s0 + $0x10] sm:$0xff]  ;;  %v31_v13 = vld [vmem:[%s1131_s0 + $0xa0] sm:$0xff] }
   0x4   :  { %737 = vmatprep.subr.msk.bf16.mxu0 %vm838_vm1, %v735_v4  ;;  %v741_v10 = vpack.c.bf16 %v30_v9, %v29_v7  ;;  %v14_v12 = vld [vmem:[%s1131_s0 + $0x18] sm:$0xff]  ;;  %v32_v14 = vld [vmem:[%s1131_s0 + $0xa8] sm:$0xff]  ;;  %v43_v17 = vld [vmem:[%s1132_s1] sm:$0xff] }
   0x5   :  { %740 = vmatpush3.bf16.xpose.msk.msra.mxu0 %vm838_vm1, %v738_v8  ;;  %v744_v15 = vpack.c.bf16 %v14_v12, %v13_v11  ;;  %v747_v16 = vpack.c.bf16 %v32_v14, %v31_v13  ;;  %731 = vmatprep.mubr.msk.f32.mxu0 %vm61_vm0, %v43_v17  ;;  %v15_v18 = vld [vmem:[%s1131_s0 + $0x20] sm:$0xff]  ;;  %v16_v19 = vld [vmem:[%s1131_s0 + $0x28] sm:$0xff]  ;;  %v33_v20 = vld [vmem:[%s1131_s0 + $0xb0] sm:$0xff]  ;;  %v814_v8 = vmov 8  }
   0x6   :  { %743 = vmatprep.subr.msk.bf16.mxu0 %vm838_vm1, %v741_v10  ;;  %53 = vperm.xlu0 %794, %v43_v17   ;;  %v34_v21 = vld [vmem:[%s1131_s0 + $0xb8] sm:$0xff]  ;;  %v750_v22 = vpack.c.bf16 %v16_v19, %v15_v18  ;;  %v44_v23 = vld [vmem:[%s1132_s1 + $0x8] sm:$0xff]  ;;  %v17_v25 = vld [vmem:[%s1131_s0 + $0x30] sm:$0xff] }
   0x7   :  { %v753_v24 = vpack.c.bf16 %v34_v21, %v33_v20  ;;  %v18_v26 = vld [vmem:[%s1131_s0 + $0x38] sm:$0xff]  ;;  %v35_v27 = vld [vmem:[%s1131_s0 + $0xc0] sm:$0xff]  ;;  %v36_v28 = vld [vmem:[%s1131_s0 + $0xc8] sm:$0xff] }
   0x8   :  { %v756_v29 = vpack.c.bf16 %v18_v26, %v17_v25  ;;  %v759_v30 = vpack.c.bf16 %v36_v28, %v35_v27  ;;  %v19_v31 = vld [vmem:[%s1131_s0 + $0x40] sm:$0xff]  ;;  %v20_v32 = vld [vmem:[%s1131_s0 + $0x48] sm:$0xff]  ;;  %v37_v33 = vld [vmem:[%s1131_s0 + $0xd0] sm:$0xff] }
   0x9   :  { %v38_v34 = vld [vmem:[%s1131_s0 + $0xd8] sm:$0xff]  ;;  %v762_v35 = vpack.c.bf16 %v20_v32, %v19_v31  ;;  %v21_v37 = vld [vmem:[%s1131_s0 + $0x50] sm:$0xff]  ;;  %v39_v39 = vld [vmem:[%s1131_s0 + $0xe0] sm:$0xff] }
   0xa   :  { %58 = vperm.xlu0 %794, %v44_v23   ;;  %v765_v36 = vpack.c.bf16 %v38_v34, %v37_v33  ;;  %v22_v38 = vld [vmem:[%s1131_s0 + $0x58] sm:$0xff]  ;;  %v40_v40 = vld [vmem:[%s1131_s0 + $0xe8] sm:$0xff]  ;;  %v23_v43 = vld [vmem:[%s1131_s0 + $0x60] sm:$0xff] }
   0xb   :  { %v768_v41 = vpack.c.bf16 %v22_v38, %v21_v37  ;;  %v771_v42 = vpack.c.bf16 %v40_v40, %v39_v39  ;;  %v24_v44 = vld [vmem:[%s1131_s0 + $0x68] sm:$0xff]  ;;  %v41_v45 = vld [vmem:[%s1131_s0 + $0xf0] sm:$0xff]  ;;  %v42_v46 = vld [vmem:[%s1131_s0 + $0xf8] sm:$0xff] }
   0xc   :  { %v774_v47 = vpack.c.bf16 %v24_v44, %v23_v43  ;;  %v777_v48 = vpack.c.bf16 %v42_v46, %v41_v45  ;;  %v25_v49 = vld [vmem:[%s1131_s0 + $0x70] sm:$0xff]  ;;  %v26_v50 = vld [vmem:[%s1131_s0 + $0x78] sm:$0xff]  ;;  %vm784_vm4 = vmpackc.low %vm251_vm2, %vm813_vm3 }
   0xd   :  { %746 = vmatpush3.bf16.xpose.msk.msra.mxu0 %vm838_vm1, %v744_v15  ;;  %v780_v51 = vpack.c.bf16 %v26_v50, %v25_v49  ;;  %v45_v53 = vld [vmem:[%s1132_s1 + $0x10] sm:$0xff]  ;;  %v46_v7 = vld [vmem:[%s1132_s1 + $0x18] sm:$0xff]  ;;  %v48_v9 = vld [vmem:[%s1132_s1 + $0x28] sm:$0xff] }
   0xe   :  { %749 = vmatprep.subr.msk.bf16.mxu0 %vm838_vm1, %v747_v16  ;;  %245 = vperm.xlu1 %795, %v45_v53   ;;  %v49_v10 = vld [vmem:[%s1132_s1 + $0x30] sm:$0xff]  ;;  %v47_v20 = vld [vmem:[%s1132_s1 + $0x20] sm:$0xff]  ;;  %v50_v21 = vld [vmem:[%s1132_s1 + $0x38] sm:$0xff] }
   0xf   :  { %797 = vset.pattern.permute.xlu0 %v814_v8 }
  0x10   :  { %418 = vperm.xlu0 %797, %v47_v20  }
  0x12   :  { %796 = vset.pattern.permute.xlu1 %v814_v8 }
  0x13   :  { %337 = vperm.xlu1 %796, %v46_v7  }
  0x14   :  { %433 = vperm.xlu0 %797, %v50_v21  }
  0x15   :  { %752 = vmatpush3.bf16.xpose.msk.msra.mxu0 %vm838_vm1, %v750_v22 }
  0x16   :  { %755 = vmatprep.subr.msk.bf16.mxu0 %vm838_vm1, %v753_v24 }
  0x17   :  { %423 = vperm.xlu1 %796, %v48_v9  }
  0x1b   :  { %428 = vperm.xlu1 %796, %v49_v10  }
  0x1d   :  { %758 = vmatpush3.bf16.xpose.msk.msra.mxu0 %vm838_vm1, %v756_v29 }
  0x1e   :  { %761 = vmatprep.subr.msk.bf16.mxu0 %vm838_vm1, %v759_v30 }
  0x25   :  { %764 = vmatpush3.bf16.xpose.msk.msra.mxu0 %vm838_vm1, %v762_v35 }
  0x26   :  { %767 = vmatprep.subr.msk.bf16.mxu0 %vm838_vm1, %v765_v36 }
  0x2d   :  { %770 = vmatpush3.bf16.xpose.msk.msra.mxu0 %vm838_vm1, %v768_v41 }
  0x2e   :  { %773 = vmatprep.subr.msk.bf16.mxu0 %vm838_vm1, %v771_v42 }
  0x35   :  { %776 = vmatpush3.bf16.xpose.msk.msra.mxu0 %vm838_vm1, %v774_v47 }
  0x36   :  { %779 = vmatprep.subr.msk.bf16.mxu0 %vm838_vm1, %v777_v48 }
  0x3d   :  { %782 = vmatpush3.bf16.xpose.msk.msra.mxu0 %vm838_vm1, %v780_v51 }
  0x44   :  { %732 = vmatmul.mubr.msk.f32.vlgmr.msra.gmra.mrb[0].mxu0 %vm61_vm0, %v43_v17 }
  0x45   :  { %733 = vmatprep.mubr.msk.f32.mxu0 %vm61_vm0, %v44_v23 }
  0x48   :  { %734 = vmatmul.mubr.msk.f32.gmra.mrb[2].mxu0 %vm61_vm0, %v44_v23 }
  0x85   :  { %v54_v55 = vpop.permute.xlu0 %53 }
  0x89   :  { %v59_v60 = vpop.permute.xlu0 %58 }
  0x8d   :  { %v246_v11 = vpop.permute.xlu1 %245 }
  0x8f   :  { %v419_v29 = vpop.permute.xlu0 %418 }
  0x92   :  { %v338_v22 = vpop.permute.xlu1 %337 }
  0x96   :  { %v424_v33 = vpop.permute.xlu1 %423 }
  0x9a   :  { %v429_v44 = vpop.permute.xlu1 %428 }
 0x117   :  { %v228_v56 = vpop.f32.mrb[0].mxu0 }
 0x118   :  { %v229_v57 = vadd.f32 %v228_v56, %v54_v55  ;;  %v230_v58 = vpop.f32.mrb[1].mxu0 }
 0x119   :  { %v231_v59 = vadd.f32 %v230_v58, %v54_v55 }
 0x11a   :  { %798 = vtanh.f32 %v229_v57 }
 0x11b   :  { %v234_v61 = vpop.f32.mrb[2].mxu0  ;;  %800 = vtanh.f32 %v231_v59 }
 0x11c   :  { %v235_v62 = vadd.f32 %v234_v61, %v59_v60  ;;  %v236_v63 = vpop.f32.mrb[3].mxu0 }
 0x11d   :  { %v237_v0 = vadd.f32 %v236_v63, %v59_v60 }
 0x11e   :  { %802 = vtanh.f32 %v235_v62 }
 0x11f   :  { %804 = vtanh.f32 %v237_v0 }
 0x124   :  { %v799_v1 = vpop.eup %798 }
 0x125   :  { %v801_v2 = vpop.eup %800 }
 0x128   :  { %v803_v3 = vpop.eup %802 }
 0x129   :  { %v805_v4 = vpop.eup %804  ;;  %v786_v5 = vpack.c.bf16 %v803_v3, %v799_v1 }
 0x12a   :  { %v783_v6 = vpack.c.bf16 %v805_v4, %v801_v2 }
 0x12c   :  { %785 = vmatprep.subr.msk.bf16.mxu1 %vm784_vm4, %v783_v6 }
 0x12d   :  { %788 = vmatpush1.bf16.msk.msra.mxu1 %vm784_vm4, %v786_v5 }
 0x130   :  { %693 = vmatmul.mubr.msk.f32.vlgmr.msra.gmra.mrb[0].mxu1 %vm248_vm5, %v45_v53  ;;  %v434_v53 = vpop.permute.xlu0 %433 }
 0x131   :  { %407 = vmatprep.mubr.f32.mxu1 %v811_v52 }
 0x203   :  { %v324_v12 = vpop.f32.mrb[0].mxu1 }
 0x204   :  { %v325_v13 = vadd.f32 %v324_v12, %v246_v11  ;;  %v326_v14 = vpop.f32.mrb[1].mxu1 }
 0x205   :  { %v327_v15 = vadd.f32 %v326_v14, %v246_v11 }
 0x206   :  { %v331_v16 = vmul.f32 0.01, %v325_v13  ;;  %vm329_vm6 = vcmp.ge.f32.partialorder %v325_v13, 0.0 }
 0x207   :  { %v332_v17 = vmul.f32 0.01, %v327_v15  ;;  %vm330_vm7 = vcmp.ge.f32.partialorder %v327_v15, 0.0 }
 0x208   :  { %v333_v19 = vsel %vm329_vm6, %v325_v13, %v331_v16 }
 0x209   :  { %v334_v18 = vsel %vm330_vm7, %v327_v15, %v332_v17 }
 0x20a   :  { %343 = vmatprep.subr.mxu1 %v334_v18 }
 0x20b   :  { %344 = vmatpush1.msra.mxu1 %v333_v19 }
 0x20c   :  { %694 = vmatmul.mubr.msk.f32.vlgmr.msra.gmra.mrb[2].mxu1 %vm340_vm8, %v46_v7 }
 0x20d   :  { %508 = vmatprep.mubr.f32.mxu1 %v811_v52 }
 0x2df   :  { %v409_v23 = vpop.f32.mrb[2].mxu1 }
 0x2e0   :  { %v410_v24 = vadd.f32 %v409_v23, %v338_v22  ;;  %v411_v25 = vpop.f32.mrb[3].mxu1 }
 0x2e1   :  { %v412_v26 = vadd.f32 %v411_v25, %v338_v22 }
 0x2e3   :  { %806 = vtanh.f32 %v412_v26 }
 0x2e4   :  { %808 = vtanh.f32 %v410_v24 }
 0x2ed   :  { %v807_v27 = vpop.eup %806 }
 0x2ee   :  { %v809_v28 = vpop.eup %808  ;;  %444 = vmatprep.subr.mxu1 %v807_v27 }
 0x2ef   :  { %445 = vmatpush1.msra.mxu1 %v809_v28 }
 0x2f0   :  { %695 = vmatmul.mubr.msk.f32.vlgmr.msra.gmra.mrb[4].mxu1 %vm340_vm8, %v47_v20 }
 0x2f1   :  { %514 = vmatprep.mubr.f32.mxu1 %v811_v52 }
 0x2f4   :  { %696 = vmatmul.mubr.msk.f32.gmra.mrb[6].mxu1 %vm340_vm8, %v48_v9 }
 0x2f5   :  { %520 = vmatprep.mubr.f32.mxu1 %v811_v52 }
 0x2f8   :  { %697 = vmatmul.mubr.msk.f32.gmra.mrb[8].mxu1 %vm340_vm8, %v49_v10 }
 0x2f9   :  { %526 = vmatprep.mubr.f32.mxu1 %v811_v52 }
 0x2fc   :  { %698 = vmatmul.mubr.msk.f32.gmra.mrb[10].mxu1 %vm340_vm8, %v50_v21 }
 0x3c3   :  { %v510_v30 = vpop.f32.mrb[4].mxu1 }
 0x3c4   :  { %v511_v31 = vadd.f32 %v510_v30, %v419_v29  ;;  %v512_v32 = vpop.f32.mrb[5].mxu1 }
 0x3c5   :  { %v513_v34 = vadd.f32 %v512_v32, %v419_v29 }
 0x3c6   :  { %v541_v35 = vmul.f32 0.01, %v511_v31  ;;  %vm533_vm9 = vcmp.ge.f32.partialorder %v511_v31, 0.0 }
 0x3c7   :  { %v542_v36 = vmul.f32 0.01, %v513_v34  ;;  %v516_v37 = vpop.f32.mrb[6].mxu1  ;;  %vm534_vm10 = vcmp.ge.f32.partialorder %v513_v34, 0.0 }
 0x3c8   :  { %v517_v38 = vadd.f32 %v516_v37, %v424_v33  ;;  %v518_v39 = vpop.f32.mrb[7].mxu1  ;;  %v549_v40 = vsel %vm533_vm9, %v511_v31, %v541_v35 }
 0x3c9   :  { %v519_v41 = vadd.f32 %v518_v39, %v424_v33  ;;  %557 = vxpose.xlu1.b32.start [1/4] (short) %v549_v40, 128  ;;  %v550_v42 = vsel %vm534_vm10, %v513_v34, %v542_v36 }
 0x3ca   :  { %vm535_vm11 = vcmp.ge.f32.partialorder %v517_v38, 0.0  ;;  %v543_v43 = vmul.f32 0.01, %v517_v38  ;;  %589 = vxpose.xlu0.b32.start [1/4] (short) %v550_v42, 128 }
 0x3cb   :  { %vm536_vm12 = vcmp.ge.f32.partialorder %v519_v41, 0.0  ;;  %v544_v45 = vmul.f32 0.01, %v519_v41  ;;  %v522_v46 = vpop.f32.mrb[8].mxu1 }
 0x3cc   :  { %v523_v47 = vadd.f32 %v522_v46, %v429_v44  ;;  %v524_v48 = vpop.f32.mrb[9].mxu1  ;;  %v551_v49 = vsel %vm535_vm11, %v517_v38, %v543_v43 }
 0x3cd   :  { %v525_v50 = vadd.f32 %v524_v48, %v429_v44  ;;  %558 = vxpose.xlu1.b32.cont [2/4] (short) %v551_v49, 128  ;;  %v552_v51 = vsel %vm536_vm12, %v519_v41, %v544_v45 }
 0x3ce   :  { %vm537_vm13 = vcmp.ge.f32.partialorder %v523_v47, 0.0  ;;  %v545_v52 = vmul.f32 0.01, %v523_v47  ;;  %590 = vxpose.xlu0.b32.cont [2/4] (short) %v552_v51, 128 }
 0x3cf   :  { %vm538_vm14 = vcmp.ge.f32.partialorder %v525_v50, 0.0  ;;  %v546_v54 = vmul.f32 0.01, %v525_v50  ;;  %v528_v55 = vpop.f32.mrb[10].mxu1 }
 0x3d0   :  { %v529_v56 = vadd.f32 %v528_v55, %v434_v53  ;;  %v530_v57 = vpop.f32.mrb[11].mxu1  ;;  %v553_v58 = vsel %vm537_vm13, %v523_v47, %v545_v52 }
 0x3d1   :  { %v531_v59 = vadd.f32 %v530_v57, %v434_v53  ;;  %559 = vxpose.xlu1.b32.cont [3/4] (short) %v553_v58, 128  ;;  %v554_v60 = vsel %vm538_vm14, %v525_v50, %v546_v54 }
 0x3d2   :  { %vm539_vm15 = vcmp.ge.f32.partialorder %v529_v56, 0.0  ;;  %v547_v61 = vmul.f32 0.01, %v529_v56  ;;  %591 = vxpose.xlu0.b32.cont [3/4] (short) %v554_v60, 128 }
 0x3d3   :  { %vm540_vm1 = vcmp.ge.f32.partialorder %v531_v59, 0.0  ;;  %v548_v62 = vmul.f32 0.01, %v531_v59 }
 0x3d4   :  { %v555_v63 = vsel %vm539_vm15, %v529_v56, %v547_v61 }
 0x3d5   :  { %560 = vxpose.xlu1.b32.end [4/4] (short) %v555_v63, 128  ;;  %v556_v0 = vsel %vm540_vm1, %v531_v59, %v548_v62 }
 0x3d6   :  { %592 = vxpose.xlu0.b32.end [4/4] (short) %v556_v0, 128 }
 0x449   :  { %v573_v1 = vpop.trf.xlu1 }
 0x44a   :  { %v605_v2 = vpop.trf.xlu0  ;;  %621 = vst.msk [vmem:[%s1133_s2] sm:$0xff] %vm61_vm0, %v573_v1 }
 0x44b   :  { %637 = vst.msk [vmem:[%s1133_s2 + $0x80] sm:$0xff] %vm61_vm0, %v605_v2 }
 0x44d   :  { %v574_v3 = vpop.trf.xlu1 }
 0x44e   :  { %v606_v4 = vpop.trf.xlu0  ;;  %622 = vst.msk [vmem:[%s1133_s2 + $0x8] sm:$0xff] %vm61_vm0, %v574_v3 }
 0x44f   :  { %638 = vst.msk [vmem:[%s1133_s2 + $0x88] sm:$0xff] %vm61_vm0, %v606_v4 }
 0x451   :  { %v575_v5 = vpop.trf.xlu1 }
 0x452   :  { %v607_v6 = vpop.trf.xlu0  ;;  %623 = vst.msk [vmem:[%s1133_s2 + $0x10] sm:$0xff] %vm61_vm0, %v575_v5 }
 0x453   :  { %639 = vst.msk [vmem:[%s1133_s2 + $0x90] sm:$0xff] %vm61_vm0, %v607_v6 }
 0x455   :  { %v576_v7 = vpop.trf.xlu1 }
 0x456   :  { %v608_v8 = vpop.trf.xlu0  ;;  %624 = vst.msk [vmem:[%s1133_s2 + $0x18] sm:$0xff] %vm61_vm0, %v576_v7 }
 0x457   :  { %640 = vst.msk [vmem:[%s1133_s2 + $0x98] sm:$0xff] %vm61_vm0, %v608_v8 }
 0x459   :  { %v577_v9 = vpop.trf.xlu1 }
 0x45a   :  { %v609_v10 = vpop.trf.xlu0  ;;  %625 = vst.msk [vmem:[%s1133_s2 + $0x20] sm:$0xff] %vm61_vm0, %v577_v9 }
 0x45b   :  { %641 = vst.msk [vmem:[%s1133_s2 + $0xa0] sm:$0xff] %vm61_vm0, %v609_v10 }
 0x45d   :  { %v578_v11 = vpop.trf.xlu1 }
 0x45e   :  { %v610_v12 = vpop.trf.xlu0  ;;  %626 = vst.msk [vmem:[%s1133_s2 + $0x28] sm:$0xff] %vm61_vm0, %v578_v11 }
 0x45f   :  { %642 = vst.msk [vmem:[%s1133_s2 + $0xa8] sm:$0xff] %vm61_vm0, %v610_v12 }
 0x461   :  { %v579_v13 = vpop.trf.xlu1 }
 0x462   :  { %v611_v14 = vpop.trf.xlu0  ;;  %627 = vst.msk [vmem:[%s1133_s2 + $0x30] sm:$0xff] %vm61_vm0, %v579_v13 }
 0x463   :  { %643 = vst.msk [vmem:[%s1133_s2 + $0xb0] sm:$0xff] %vm61_vm0, %v611_v14 }
 0x465   :  { %v580_v15 = vpop.trf.xlu1 }
 0x466   :  { %v612_v16 = vpop.trf.xlu0  ;;  %628 = vst.msk [vmem:[%s1133_s2 + $0x38] sm:$0xff] %vm61_vm0, %v580_v15 }
 0x467   :  { %644 = vst.msk [vmem:[%s1133_s2 + $0xb8] sm:$0xff] %vm61_vm0, %v612_v16 }
 0x469   :  { %v581_v17 = vpop.trf.xlu1 }
 0x46a   :  { %v613_v18 = vpop.trf.xlu0  ;;  %629 = vst.msk [vmem:[%s1133_s2 + $0x40] sm:$0xff] %vm61_vm0, %v581_v17 }
 0x46b   :  { %645 = vst.msk [vmem:[%s1133_s2 + $0xc0] sm:$0xff] %vm61_vm0, %v613_v18 }
 0x46d   :  { %v582_v19 = vpop.trf.xlu1 }
 0x46e   :  { %v614_v20 = vpop.trf.xlu0  ;;  %630 = vst.msk [vmem:[%s1133_s2 + $0x48] sm:$0xff] %vm61_vm0, %v582_v19 }
 0x46f   :  { %646 = vst.msk [vmem:[%s1133_s2 + $0xc8] sm:$0xff] %vm61_vm0, %v614_v20 }
 0x471   :  { %v583_v21 = vpop.trf.xlu1 }
 0x472   :  { %v615_v22 = vpop.trf.xlu0  ;;  %631 = vst.msk [vmem:[%s1133_s2 + $0x50] sm:$0xff] %vm61_vm0, %v583_v21 }
 0x473   :  { %647 = vst.msk [vmem:[%s1133_s2 + $0xd0] sm:$0xff] %vm61_vm0, %v615_v22 }
 0x475   :  { %v584_v23 = vpop.trf.xlu1 }
 0x476   :  { %v616_v24 = vpop.trf.xlu0  ;;  %632 = vst.msk [vmem:[%s1133_s2 + $0x58] sm:$0xff] %vm61_vm0, %v584_v23 }
 0x477   :  { %648 = vst.msk [vmem:[%s1133_s2 + $0xd8] sm:$0xff] %vm61_vm0, %v616_v24 }
 0x479   :  { %v585_v25 = vpop.trf.xlu1 }
 0x47a   :  { %v617_v26 = vpop.trf.xlu0  ;;  %633 = vst.msk [vmem:[%s1133_s2 + $0x60] sm:$0xff] %vm61_vm0, %v585_v25 }
 0x47b   :  { %649 = vst.msk [vmem:[%s1133_s2 + $0xe0] sm:$0xff] %vm61_vm0, %v617_v26 }
 0x47d   :  { %v586_v27 = vpop.trf.xlu1 }
 0x47e   :  { %v618_v28 = vpop.trf.xlu0  ;;  %634 = vst.msk [vmem:[%s1133_s2 + $0x68] sm:$0xff] %vm61_vm0, %v586_v27 }
 0x47f   :  { %650 = vst.msk [vmem:[%s1133_s2 + $0xe8] sm:$0xff] %vm61_vm0, %v618_v28 }
 0x481   :  { %v587_v29 = vpop.trf.xlu1 }
 0x482   :  { %v619_v30 = vpop.trf.xlu0  ;;  %635 = vst.msk [vmem:[%s1133_s2 + $0x70] sm:$0xff] %vm61_vm0, %v587_v29 }
 0x483   :  { %651 = vst.msk [vmem:[%s1133_s2 + $0xf0] sm:$0xff] %vm61_vm0, %v619_v30 }
 0x485   :  { %v588_v31 = vpop.trf.xlu1 }
 0x486   :  { %v620_v32 = vpop.trf.xlu0  ;;  %636 = vst.msk [vmem:[%s1133_s2 + $0x78] sm:$0xff] %vm61_vm0, %v588_v31 }
 0x487   :  { %652 = vst.msk [vmem:[%s1133_s2 + $0xf8] sm:$0xff] %vm61_vm0, %v620_v32 }

</bundles_post_ra>
